<compile_context>
chip_gen: v7x
topology: tpu7x:2x2x1
jax: 0.10.0
libtpu: 0.0.40
codegen_flags: <defaults>
</compile_context>

<pallas_src>
import math

import jax
import jax.numpy as jnp
from jax import lax
from jax.experimental import pallas as pl
from jax.experimental.pallas import tpu as pltpu

LN_EPS = 1e-5  # torch.nn.LayerNorm default


def _round_up(x, m):
    return ((x + m - 1) // m) * m


# ----------------------------- Pallas kernel -----------------------------

def _fused_kernel(x_ref, idx_ref, w_ref, sel_ref, col_ref, tab_ref, m_ref,
                  gamma_ref, beta_ref, out_ref):
    """One row tile; PACK consecutive tokens are packed per 128-lane row.

    x_ref   : (TMp, PACK*KTOK)      bf16  packed input slab
    idx_ref : (TMp, 2*PACK)         f32   global one-hot target columns
    w_ref   : (PACK*KTOK, 2*PACK*H) bf16  block-diagonal projection weights
    sel_ref : (2*PACK, PACK*NTAB)   f32   per-lane target selector
    col_ref : (1, PACK*NTAB)        f32   column iota
    tab_ref : (PACK*NTAB, PACK*H)   f32   block-diagonal [type_table ; pe]
    m_ref   : (PACK*H, PACK*H)      f32   per-token-group averaging matrix
    gamma/beta : (1, PACK*H)        f32
    out_ref : (TMp, PACK*H)         f32
    """
    hp = m_ref.shape[0]  # PACK * H : lane width of the packed output

    # 1) Single block-diagonal projection.  Per token group: lanes [:hp] hold
    #    the d/m linear part, lanes [hp:] the pre-tanh (P0-linear+bias | var).
    res = jnp.dot(x_ref[...], w_ref[...], preferred_element_type=jnp.float32)
    ev = res[:, :hp] + jnp.tanh(res[:, hp:])

    # 2) In-kernel type+time embedding gather.  `target` broadcasts, per lane,
    #    the single one-hot column that may fire there; one compare builds the
    #    one-hot; one matmul against the stacked table does type + time at once.
    target = jnp.dot(idx_ref[...], sel_ref[...],
                     preferred_element_type=jnp.float32)
    oh = (jnp.abs(target - col_ref[...]) < 0.5).astype(jnp.float32)
    ev = ev + jnp.dot(oh, tab_ref[...], preferred_element_type=jnp.float32)

    # 3) Per-token LayerNorm on the packed (lane-group) layout: group mean and
    #    group variance via a tiny block-diagonal averaging matmul (MXU slack).
    mean = jnp.dot(ev, m_ref[...], preferred_element_type=jnp.float32)
    xc = ev - mean
    var = jnp.dot(xc * xc, m_ref[...], preferred_element_type=jnp.float32)
    out_ref[...] = (xc * lax.rsqrt(var + LN_EPS)) * gamma_ref[...] + beta_ref[...]


# ----------------------------- Pallas wrapper -----------------------------

def _choose_grid(n_tokens, row_tile, unit):
    """Balanced tiles, no padding blow-up, >=2 even 'parallel' steps (v7x)."""
    steps = max(1, pl.cdiv(n_tokens, row_tile))
    if n_tokens > unit:                     # enough work to split across 2 TCs
        steps = max(2, steps)
        steps += steps % 2                  # even step count -> balanced megacore
    tile = _round_up(pl.cdiv(n_tokens, steps), unit)
    return steps, tile, tile * steps


def fused_input_embedding(x, typ, tim, w_dm, w_pv, tab, gamma, beta, *,
                          type_size, row_tile=2048, pack=None):
    """x: (N, K) f32 token slab, typ/tim: (N,) int32. Returns (N, H) f32."""
    n, k_raw = x.shape
    h = w_dm.shape[1]
    n_tab = tab.shape[0]

    pack = pack or max(1, 128 // h)          # tokens per 128-lane row
    ktok = _round_up(k_raw, 16)              # bf16-friendly per-token K stride
    hp = pack * h

    unit = pack * 16                         # token granularity of one tile
    steps, tile, n_pad = _choose_grid(n, row_tile, unit)
    tmp = tile // pack                       # packed rows per grid step
    rows = n_pad // pack

    # ---- pack inputs: `pack` consecutive tokens per row, bf16 slabs ----
    xp = jnp.zeros((n_pad, ktok), jnp.float32).at[:n, :k_raw].set(x)
    xp = xp.reshape(rows, pack * ktok).astype(jnp.bfloat16)

    boff = jnp.arange(pack, dtype=jnp.int32) * n_tab
    typ_p = jnp.zeros((n_pad,), jnp.int32).at[:n].set(typ)
    tim_p = jnp.zeros((n_pad,), jnp.int32).at[:n].set(tim)
    idx = jnp.concatenate(
        [typ_p.reshape(rows, pack) + boff[None, :],
         tim_p.reshape(rows, pack) + boff[None, :] + type_size],
        axis=1).astype(jnp.float32)                          # (rows, 2*pack)

    # ---- tiny block-diagonal parameter slabs (VMEM-resident) ----
    k_dm = w_dm.shape[0]
    w_big = jnp.zeros((pack * ktok, 2 * hp), jnp.float32)
    tab_big = jnp.zeros((pack * n_tab, hp), jnp.float32)
    for b in range(pack):
        w_big = w_big.at[b * ktok: b * ktok + k_dm,
                         b * h:(b + 1) * h].set(w_dm)
        w_big = w_big.at[b * ktok + k_dm: b * ktok + k_raw,
                         hp + b * h: hp + (b + 1) * h].set(w_pv)
        tab_big = tab_big.at[b * n_tab:(b + 1) * n_tab,
                             b * h:(b + 1) * h].set(tab)
    w_big = w_big.astype(jnp.bfloat16)

    c = jnp.arange(pack * n_tab, dtype=jnp.int32)
    jsel = jnp.where((c % n_tab) < type_size, c // n_tab, pack + c // n_tab)
    sel = (jsel[None, :] == jnp.arange(2 * pack)[:, None]).astype(jnp.float32)
    col = c.astype(jnp.float32)[None, :]

    g = jnp.arange(hp) // h
    m_mat = (g[:, None] == g[None, :]).astype(jnp.float32) / h

    gamma_p = jnp.tile(gamma.reshape(1, h), (1, pack))
    beta_p = jnp.tile(beta.reshape(1, h), (1, pack))

    def row_spec(width):
        return pl.BlockSpec((tmp, width), lambda i: (i, 0))

    def resident(arr):
        # Full-array block, same block every step -> stays VMEM-resident.
        return pl.BlockSpec(arr.shape, lambda i: (0, 0))

    out = pl.pallas_call(
        _fused_kernel,
        grid=(steps,),
        in_specs=[row_spec(pack * ktok), row_spec(2 * pack),
                  resident(w_big), resident(sel), resident(col),
                  resident(tab_big), resident(m_mat),
                  resident(gamma_p), resident(beta_p)],
        out_specs=pl.BlockSpec((tmp, hp), lambda i: (i, 0)),
        out_shape=jax.ShapeDtypeStruct((rows, hp), jnp.float32),
        compiler_params=pltpu.CompilerParams(
            dimension_semantics=("parallel",)),
    )(xp, idx, w_big, sel, col, tab_big, m_mat, gamma_p, beta_p)

    # Unpack (rows, PACK*H) -> (n_pad, H); only the first n rows are valid.
    return out.reshape(n_pad, h)[:n]


# ----------------------------- Parameter setup -----------------------------

class Config:
    P0_size = 16
    nd = 32
    nm = 24
    nv = 20
    type_size = 6
    hidden_size = 32
    max_time_embedding = 64
    time_emb = 'sin'
    hidden_dropout_prob = 0.1
    padd_indx_type = 0
    padd_indx_time = 1


def make_sinusoidal_pe(d_model, max_len, padd_indx):
    position = jnp.arange(0, max_len, dtype=jnp.float32)[:, None]
    div_term = jnp.exp(jnp.arange(0, d_model, 2, dtype=jnp.float32)
                       * -(math.log(10000.0) / d_model))
    pe = jnp.zeros((max_len, d_model), jnp.float32)
    pe = pe.at[:, 0::2].set(jnp.sin(position * div_term))
    pe = pe.at[:, 1::2].set(jnp.cos(position * div_term))
    if padd_indx:  # replicate the `if padd_indx:` truthiness check from torch
        pe = pe.at[padd_indx, :].set(0.0)
    return pe


def init_params(cfg, key):
    ks = jax.random.split(key, 8)
    H = cfg.hidden_size
    scale = 0.02
    params = {
        # nn.Linear weights are (H, in) in torch; stored pre-transposed (in, H).
        'wp': scale * jax.random.normal(ks[0], (cfg.P0_size, H), jnp.float32),
        'bp': scale * jax.random.normal(ks[1], (1, H), jnp.float32),
        'wd': scale * jax.random.normal(ks[2], (cfg.nd, H), jnp.float32),
        'wm': scale * jax.random.normal(ks[3], (cfg.nm, H), jnp.float32),
        'wv': scale * jax.random.normal(ks[4], (cfg.nv, H), jnp.float32),
        'type_table': scale * jax.random.normal(ks[5], (cfg.type_size, H),
                                                jnp.float32),
        'gamma': jnp.ones((1, H), jnp.float32),
        'beta': jnp.zeros((1, H), jnp.float32),
    }
    # nn.Embedding(padding_idx=...) zeroes that row at init.
    params['type_table'] = params['type_table'].at[cfg.padd_indx_type, :].set(0.0)
    params['pe'] = make_sinusoidal_pe(H, cfg.max_time_embedding,
                                      cfg.padd_indx_time)
    return params


# ----------------------------- Forward pass -----------------------------

def input_embedding_forward(params, P0, d0, m0, d, m, var, times, types):
    f32 = jnp.float32
    B, L, nd = d.shape
    nm = m.shape[-1]
    nv = var.shape[-1]
    p0s = P0.shape[-1]
    H = params['wd'].shape[1]
    S = L + 3
    N = B * S
    type_size = params['type_table'].shape[0]

    # Fused parameter slabs (tiny; fused under jit).
    w_dm = jnp.concatenate([params['wd'], params['wm']], axis=0)           # (nd+nm, H)
    w_pv = jnp.concatenate([params['wp'], params['bp'], params['wv']], 0)  # (P0+1+nv, H)
    tab = jnp.concatenate([params['type_table'], params['pe']], axis=0)    # (T+Tmax, H)

    # Homogeneous token-row slab; token order per batch element is
    # [P0, d0, m0, event_1..event_L] exactly as in the torch cat().
    pre_dm = jnp.stack([
        jnp.zeros((B, nd + nm), f32),                               # P0 token
        jnp.concatenate([d0, jnp.zeros((B, nm), f32)], axis=-1),    # d0 token
        jnp.concatenate([jnp.zeros((B, nd), f32), m0], axis=-1),    # m0 token
    ], axis=1)                                                      # (B, 3, nd+nm)
    ev_dm = jnp.concatenate([d, m], axis=-1)                        # (B, L, nd+nm)
    x_dm = jnp.concatenate([pre_dm, ev_dm], axis=1).reshape(N, nd + nm)

    kpv = p0s + 1 + nv
    p0_row = jnp.concatenate(
        [P0, jnp.ones((B, 1), f32), jnp.zeros((B, nv), f32)], axis=-1)
    pre_pv = jnp.concatenate(
        [p0_row[:, None, :], jnp.zeros((B, 2, kpv), f32)], axis=1)   # (B, 3, kpv)
    ev_pv = jnp.concatenate(
        [jnp.zeros((B, L, p0s + 1), f32), var], axis=-1)             # (B, L, kpv)
    # TODO(synk): event rows still carry p0s+1 structural-zero columns (~13% of
    # read bytes); could be stripped with a separate prefix path if needed.
    x_pv = jnp.concatenate([pre_pv, ev_pv], axis=1).reshape(N, kpv)

    x = jnp.concatenate([x_dm, x_pv], axis=-1)                       # (N, 93)

    typ = types.reshape(N).astype(jnp.int32)
    tim = times.reshape(N).astype(jnp.int32)

    out = fused_input_embedding(x, typ, tim, w_dm, w_pv, tab,
                                params['gamma'], params['beta'],
                                type_size=type_size)
    # Dropout is identity in eval mode.
    return out.reshape(B, S, H)


def reference_forward(params, P0, d0, m0, d, m, var, times, types):
    """Pure-JAX f32 mirror of the torch forward, for verification."""
    p0e = jnp.tanh(P0 @ params['wp'] + params['bp'])
    d0e = d0 @ params['wd']
    m0e = m0 @ params['wm']
    de = d @ params['wd']
    me = m @ params['wm']
    ve = jnp.tanh(var @ params['wv'])
    event = me + de + ve
    event = jnp.concatenate([p0e[:, None, :], d0e[:, None, :],
                             m0e[:, None, :], event], axis=1)
    emb = event + jnp.take(params['type_table'], types, axis=0)
    emb = emb + jnp.take(params['pe'], times, axis=0)
    mean = jnp.mean(emb, axis=-1, keepdims=True)
    v = jnp.mean((emb - mean) ** 2, axis=-1, keepdims=True)
    return (emb - mean) * lax.rsqrt(v + LN_EPS) * params['gamma'] + params['beta']


# ----------------------------- Main -----------------------------

if __name__ == "__main__":
    cfg = Config()
    B, L = 2, 8
    S = L + 3

    key = jax.random.PRNGKey(0)
    ks = jax.random.split(key, 8)
    P0 = jax.random.normal(ks[0], (B, cfg.P0_size), jnp.float32)
    d0 = jax.random.normal(ks[1], (B, cfg.nd), jnp.float32)
    m0 = jax.random.normal(ks[2], (B, cfg.nm), jnp.float32)
    d = jax.random.normal(ks[3], (B, L, cfg.nd), jnp.float32)
    m = jax.random.normal(ks[4], (B, L, cfg.nm), jnp.float32)
    var = jax.random.normal(ks[5], (B, L, cfg.nv), jnp.float32)
    types = jax.random.randint(ks[6], (B, S), 0, cfg.type_size, dtype=jnp.int32)
    times = jax.random.randint(ks[7], (B, S), 0, cfg.max_time_embedding,
                               dtype=jnp.int32)

    params = init_params(cfg, jax.random.PRNGKey(42))

    fwd = jax.jit(input_embedding_forward)
    out = fwd(params, P0, d0, m0, d, m, var, times, types)
    out = jax.block_until_ready(out)

    ref = reference_forward(params, P0, d0, m0, d, m, var, times, types)
    assert out.shape == (B, S, cfg.hidden_size), out.shape
    # bf16 input/weight slabs: tolerance loosened vs. the pure-f32 reference.
    assert jnp.allclose(out, ref, atol=2e-2, rtol=2e-2), "mismatch vs reference"

    print("KERNEL_OK")
</pallas_src>

<mosaic_0001>
module attributes {stable_mosaic.version = 11 : i64} {
  func.func @_fused_kernel(%arg0: i32, %arg1: memref<16x384xbf16, #tpu.memory_space<vmem>>, %arg2: memref<16x8xf32, #tpu.memory_space<vmem>>, %arg3: memref<384x256xbf16, #tpu.memory_space<vmem>>, %arg4: memref<8x280xf32, #tpu.memory_space<vmem>>, %arg5: memref<1x280xf32, #tpu.memory_space<vmem>>, %arg6: memref<280x128xf32, #tpu.memory_space<vmem>>, %arg7: memref<128x128xf32, #tpu.memory_space<vmem>>, %arg8: memref<1x128xf32, #tpu.memory_space<vmem>>, %arg9: memref<1x128xf32, #tpu.memory_space<vmem>>, %arg10: memref<16x128xf32, #tpu.memory_space<vmem>>) attributes {dimension_semantics = [#tpu.dimension_semantics<parallel>], iteration_bounds = array<i64: 1>, scalar_prefetch = 0 : i64, scratch_operands = 0 : i64, tpu.core_type = #tpu.core_type<tc>, window_params = [{transform_indices = @transform_0, window_bounds = array<i64: 16, 384>}, {transform_indices = @transform_1, window_bounds = array<i64: 16, 8>}, {pipeline_mode = #tpu.pipeline_mode<synchronous>, transform_indices = @transform_2, window_bounds = array<i64: 384, 256>}, {pipeline_mode = #tpu.pipeline_mode<synchronous>, transform_indices = @transform_3, window_bounds = array<i64: 8, 280>}, {pipeline_mode = #tpu.pipeline_mode<synchronous>, transform_indices = @transform_4, window_bounds = array<i64: 1, 280>}, {pipeline_mode = #tpu.pipeline_mode<synchronous>, transform_indices = @transform_5, window_bounds = array<i64: 280, 128>}, {pipeline_mode = #tpu.pipeline_mode<synchronous>, transform_indices = @transform_6, window_bounds = array<i64: 128, 128>}, {pipeline_mode = #tpu.pipeline_mode<synchronous>, transform_indices = @transform_7, window_bounds = array<i64: 1, 128>}, {pipeline_mode = #tpu.pipeline_mode<synchronous>, transform_indices = @transform_8, window_bounds = array<i64: 1, 128>}, {transform_indices = @transform_9, window_bounds = array<i64: 16, 128>}]} {
    %c0 = arith.constant 0 : index
    %c0_0 = arith.constant 0 : index
    %0 = vector.load %arg1[%c0, %c0_0] : memref<16x384xbf16, #tpu.memory_space<vmem>>, vector<16x384xbf16>
    %c0_1 = arith.constant 0 : index
    %c0_2 = arith.constant 0 : index
    %1 = vector.load %arg3[%c0_1, %c0_2] : memref<384x256xbf16, #tpu.memory_space<vmem>>, vector<384x256xbf16>
    %cst = arith.constant dense<0.000000e+00> : vector<16x256xf32>
    %2 = tpu.matmul %0, %1, %cst {dimension_numbers = #tpu.dot_dimension_numbers<[1], [0], [0], [1], [0, 0, 1, 1], [], []>} : vector<16x384xbf16>, vector<384x256xbf16>, vector<16x256xf32> -> vector<16x256xf32>
    %3 = vector.extract_strided_slice %2 {offsets = [0, 0], sizes = [16, 128], strides = [1, 1]} : vector<16x256xf32> to vector<16x128xf32>
    %4 = vector.extract_strided_slice %2 {offsets = [0, 128], sizes = [16, 128], strides = [1, 1]} : vector<16x256xf32> to vector<16x128xf32>
    %5 = math.tanh %4 : vector<16x128xf32>
    %6 = arith.addf %3, %5 : vector<16x128xf32>
    %c0_3 = arith.constant 0 : index
    %c0_4 = arith.constant 0 : index
    %7 = vector.load %arg2[%c0_3, %c0_4] : memref<16x8xf32, #tpu.memory_space<vmem>>, vector<16x8xf32>
    %c0_5 = arith.constant 0 : index
    %c0_6 = arith.constant 0 : index
    %8 = vector.load %arg4[%c0_5, %c0_6] : memref<8x280xf32, #tpu.memory_space<vmem>>, vector<8x280xf32>
    %cst_7 = arith.constant dense<0.000000e+00> : vector<16x280xf32>
    %9 = tpu.matmul %7, %8, %cst_7 {dimension_numbers = #tpu.dot_dimension_numbers<[1], [0], [0], [1], [0, 0, 1, 1], [], []>} : vector<16x8xf32>, vector<8x280xf32>, vector<16x280xf32> -> vector<16x280xf32>
    %c0_8 = arith.constant 0 : index
    %c0_9 = arith.constant 0 : index
    %10 = vector.load %arg5[%c0_8, %c0_9] : memref<1x280xf32, #tpu.memory_space<vmem>>, vector<1x280xf32>
    %11 = vector.broadcast %10 : vector<1x280xf32> to vector<16x280xf32>
    %12 = arith.subf %9, %11 : vector<16x280xf32>
    %13 = math.absf %12 : vector<16x280xf32>
    %cst_10 = arith.constant 5.000000e-01 : f32
    %14 = vector.broadcast %cst_10 : f32 to vector<16x280xf32>
    %15 = arith.cmpf olt, %13, %14 : vector<16x280xf32>
    %16 = arith.extui %15 : vector<16x280xi1> to vector<16x280xi32>
    %17 = arith.sitofp %16 : vector<16x280xi32> to vector<16x280xf32>
    %c0_11 = arith.constant 0 : index
    %c0_12 = arith.constant 0 : index
    %18 = vector.load %arg6[%c0_11, %c0_12] : memref<280x128xf32, #tpu.memory_space<vmem>>, vector<280x128xf32>
    %cst_13 = arith.constant dense<0.000000e+00> : vector<16x128xf32>
    %19 = tpu.matmul %17, %18, %cst_13 {dimension_numbers = #tpu.dot_dimension_numbers<[1], [0], [0], [1], [0, 0, 1, 1], [], []>} : vector<16x280xf32>, vector<280x128xf32>, vector<16x128xf32> -> vector<16x128xf32>
    %20 = arith.addf %6, %19 : vector<16x128xf32>
    %c0_14 = arith.constant 0 : index
    %c0_15 = arith.constant 0 : index
    %21 = vector.load %arg7[%c0_14, %c0_15] : memref<128x128xf32, #tpu.memory_space<vmem>>, vector<128x128xf32>
    %cst_16 = arith.constant dense<0.000000e+00> : vector<16x128xf32>
    %22 = tpu.matmul %20, %21, %cst_16 {dimension_numbers = #tpu.dot_dimension_numbers<[1], [0], [0], [1], [0, 0, 1, 1], [], []>} : vector<16x128xf32>, vector<128x128xf32>, vector<16x128xf32> -> vector<16x128xf32>
    %23 = arith.subf %20, %22 : vector<16x128xf32>
    %24 = arith.mulf %23, %23 : vector<16x128xf32>
    %c0_17 = arith.constant 0 : index
    %c0_18 = arith.constant 0 : index
    %25 = vector.load %arg7[%c0_17, %c0_18] : memref<128x128xf32, #tpu.memory_space<vmem>>, vector<128x128xf32>
    %cst_19 = arith.constant dense<0.000000e+00> : vector<16x128xf32>
    %26 = tpu.matmul %24, %25, %cst_19 {dimension_numbers = #tpu.dot_dimension_numbers<[1], [0], [0], [1], [0, 0, 1, 1], [], []>} : vector<16x128xf32>, vector<128x128xf32>, vector<16x128xf32> -> vector<16x128xf32>
    %cst_20 = arith.constant 9.99999974E-6 : f32
    %27 = vector.broadcast %cst_20 : f32 to vector<16x128xf32>
    %28 = arith.addf %26, %27 : vector<16x128xf32>
    %29 = math.rsqrt %28 : vector<16x128xf32>
    %30 = arith.mulf %23, %29 : vector<16x128xf32>
    %c0_21 = arith.constant 0 : index
    %c0_22 = arith.constant 0 : index
    %31 = vector.load %arg8[%c0_21, %c0_22] : memref<1x128xf32, #tpu.memory_space<vmem>>, vector<1x128xf32>
    %32 = vector.broadcast %31 : vector<1x128xf32> to vector<16x128xf32>
    %33 = arith.mulf %30, %32 : vector<16x128xf32>
    %c0_23 = arith.constant 0 : index
    %c0_24 = arith.constant 0 : index
    %34 = vector.load %arg9[%c0_23, %c0_24] : memref<1x128xf32, #tpu.memory_space<vmem>>, vector<1x128xf32>
    %35 = vector.broadcast %34 : vector<1x128xf32> to vector<16x128xf32>
    %36 = arith.addf %33, %35 : vector<16x128xf32>
    %c0_25 = arith.constant 0 : index
    %c0_26 = arith.constant 0 : index
    %37 = vector.load %arg10[%c0_25, %c0_26] : memref<16x128xf32, #tpu.memory_space<vmem>>, vector<16x128xf32>
    tpu.vector_store %arg10[%c0_25, %c0_26], %36 {strides = array<i32>} : memref<16x128xf32, #tpu.memory_space<vmem>>, vector<16x128xf32>,
    return
  }
  func.func @transform_0(%arg0: i32) -> (i32, i32) {
    %c0_i32 = arith.constant 0 : i32
    %c0_i32_0 = arith.constant 0 : i32
    return %arg0, %c0_i32 : i32, i32
  }
  func.func @transform_1(%arg0: i32) -> (i32, i32) {
    %c0_i32 = arith.constant 0 : i32
    %c0_i32_0 = arith.constant 0 : i32
    return %arg0, %c0_i32 : i32, i32
  }
  func.func @transform_2(%arg0: i32) -> (i32, i32) {
    %c0_i32 = arith.constant 0 : i32
    %c0_i32_0 = arith.constant 0 : i32
    %c0_i32_1 = arith.constant 0 : i32
    return %c0_i32, %c0_i32_0 : i32, i32
  }
  func.func @transform_3(%arg0: i32) -> (i32, i32) {
    %c0_i32 = arith.constant 0 : i32
    %c0_i32_0 = arith.constant 0 : i32
    %c0_i32_1 = arith.constant 0 : i32
    return %c0_i32, %c0_i32_0 : i32, i32
  }
  func.func @transform_4(%arg0: i32) -> (i32, i32) {
    %c0_i32 = arith.constant 0 : i32
    %c0_i32_0 = arith.constant 0 : i32
    %c0_i32_1 = arith.constant 0 : i32
    return %c0_i32, %c0_i32_0 : i32, i32
  }
  func.func @transform_5(%arg0: i32) -> (i32, i32) {
    %c0_i32 = arith.constant 0 : i32
    %c0_i32_0 = arith.constant 0 : i32
    %c0_i32_1 = arith.constant 0 : i32
    return %c0_i32, %c0_i32_0 : i32, i32
  }
  func.func @transform_6(%arg0: i32) -> (i32, i32) {
    %c0_i32 = arith.constant 0 : i32
    %c0_i32_0 = arith.constant 0 : i32
    %c0_i32_1 = arith.constant 0 : i32
    return %c0_i32, %c0_i32_0 : i32, i32
  }
  func.func @transform_7(%arg0: i32) -> (i32, i32) {
    %c0_i32 = arith.constant 0 : i32
    %c0_i32_0 = arith.constant 0 : i32
    %c0_i32_1 = arith.constant 0 : i32
    return %c0_i32, %c0_i32_0 : i32, i32
  }
  func.func @transform_8(%arg0: i32) -> (i32, i32) {
    %c0_i32 = arith.constant 0 : i32
    %c0_i32_0 = arith.constant 0 : i32
    %c0_i32_1 = arith.constant 0 : i32
    return %c0_i32, %c0_i32_0 : i32, i32
  }
  func.func @transform_9(%arg0: i32) -> (i32, i32) {
    %c0_i32 = arith.constant 0 : i32
    %c0_i32_0 = arith.constant 0 : i32
    return %arg0, %c0_i32 : i32, i32
  }
}

</mosaic_0001>

<bundles_post_ra>
// kernel: input_embedding_forward.1
= control target key start
LH: loop header
LB: loop body
LE: loop exit
PB: predicated region body
PF: predicated region fallthrough
CT: control target
= control target key end

     0   :  { %v1460_v1 = vmov 0.0   ;;  %vm436_vm0 = vcmask 64512   ;;  %vm677_vm6 = vcmask 195584   ;;  %s1871_s2 = inlined_call_operand.vmem [shape: bf16[384,256], index: 2, kind: input, shape index: {}]   ;;  %s1872_s0 = inlined_call_operand.vmem [shape: bf16[16,384], index: 0, kind: input, shape index: {}]   ;;  %s1873_s3 = inlined_call_operand.vmem [shape: f32[8,280], index: 3, kind: input, shape index: {}]   ;;  %s1874_s1 = inlined_call_operand.vmem [shape: f32[16,8], index: 1, kind: input, shape index: {}]   ;;  %s1875_s5 = inlined_call_operand.vmem [shape: f32[280,128], index: 5, kind: input, shape index: {}]   ;;  %s1876_s4 = inlined_call_operand.vmem [shape: f32[1,280], index: 4, kind: input, shape index: {}]   ;;  %s1877_s6 = inlined_call_operand.vmem [shape: f32[128,128], index: 6, kind: input, shape index: {}]   ;;  %s1878_s7 = inlined_call_operand.vmem [shape: f32[1,128], index: 7, kind: input, shape index: {}]   ;;  %s1879_s8 = inlined_call_operand.vmem [shape: f32[1,128], index: 8, kind: input, shape index: {}]   ;;  %s1880_s9 = inlined_call_operand.vmem [shape: f32[16,128], index: 9, kind: output, shape index: {}]  }
   0x1   :  { %v1376_v0 = vld [vmem:[%s1871_s2 + $0x4] ss:$8 sps:$4 sm:$0xff]   ;;  %507 = vmatprep.mubr.f32.mxu1 %v1460_v1  ;;  %v1378_v2 = vld [vmem:[%s1871_s2] ss:$8 sps:$4 sm:$0xff]   ;;  %v1379_v3 = vld [vmem:[%s1871_s2 + $0x14] ss:$8 sps:$4 sm:$0xff]  }
   0x2   :  { %341 = vmatprep.subr.bf16.mxu0 %v1376_v0  ;;  %v1381_v4 = vld [vmem:[%s1871_s2 + $0x10] ss:$8 sps:$4 sm:$0xff]   ;;  %v1382_v5 = vld [vmem:[%s1871_s2 + $0x24] ss:$8 sps:$4 sm:$0xff]   ;;  %v1384_v6 = vld [vmem:[%s1871_s2 + $0x20] ss:$8 sps:$4 sm:$0xff]  }
   0x3   :  { %342 = vmatpush1.bf16.msra.mxu0 %v1378_v2  ;;  %v1385_v7 = vld [vmem:[%s1871_s2 + $0x34] ss:$8 sps:$4 sm:$0xff]   ;;  %v1387_v8 = vld [vmem:[%s1871_s2 + $0x30] ss:$8 sps:$4 sm:$0xff]   ;;  %v1388_v9 = vld [vmem:[%s1871_s2 + $0x44] ss:$8 sps:$4 sm:$0xff]  }
   0x4   :  { %343 = vmatprep.subr.bf16.mxu0 %v1379_v3  ;;  %v1390_v10 = vld [vmem:[%s1871_s2 + $0x40] ss:$8 sps:$4 sm:$0xff]   ;;  %v1391_v11 = vld [vmem:[%s1871_s2 + $0x54] ss:$8 sps:$4 sm:$0xff]   ;;  %v1393_v12 = vld [vmem:[%s1871_s2 + $0x50] ss:$8 sps:$4 sm:$0xff]  }
   0x5   :  { %v1394_v13 = vld [vmem:[%s1871_s2 + $0x64] ss:$8 sps:$4 sm:$0xff]   ;;  %v1396_v15 = vld [vmem:[%s1871_s2 + $0x60] ss:$8 sps:$4 sm:$0xff]   ;;  %v1397_v16 = vld [vmem:[%s1871_s2 + $0x74] ss:$8 sps:$4 sm:$0xff]  }
   0x6   :  { %v1426_v14 = vld [vmem:[%s1872_s0 + $0x4] ss:$12 sps:$4 sm:$0xff]   ;;  %v1402_v19 = vld [vmem:[%s1871_s2 + $0x80] ss:$8 sps:$4 sm:$0xff]   ;;  %v1403_v20 = vld [vmem:[%s1871_s2 + $0x94] ss:$8 sps:$4 sm:$0xff]  }
   0x7   :  { %344 = vmatpush1.bf16.msra.mxu0 %v1381_v4  ;;  %373 = vmatprep.mubr.bf16.mxu0 %v1426_v14  ;;  %v1399_v17 = vld [vmem:[%s1871_s2 + $0x70] ss:$8 sps:$4 sm:$0xff]   ;;  %v1400_v18 = vld [vmem:[%s1871_s2 + $0x84] ss:$8 sps:$4 sm:$0xff]   ;;  %v1408_v38 = vld [vmem:[%s1871_s2 + $0xa0] ss:$8 sps:$4 sm:$0xff]  }
   0x8   :  { %345 = vmatprep.subr.bf16.mxu0 %v1382_v5  ;;  %v434_v21 = vld [vmem:[%s1873_s3 + $0x8] sm:$0xff]  ;;  %v433_v22 = vld [vmem:[%s1873_s3] sm:$0xff]  ;;  %v1405_v24 = vld [vmem:[%s1871_s2 + $0x90] ss:$8 sps:$4 sm:$0xff]  }
   0x9   :  { %443 = vmatprep.subr.mxu1 %v434_v21  ;;  %v1583_v23 = vld [vmem:[%s1874_s1] sm:$0xff]  ;;  %v1594_v26 = vld [vmem:[%s1874_s1 + $0x8] sm:$0xff]  ;;  %v660_v32 = vld [vmem:[%s1875_s5 + $0x90] sm:$0xff] }
   0xa   :  { %v1406_v25 = vld [vmem:[%s1871_s2 + $0xa4] ss:$8 sps:$4 sm:$0xff]   ;;  %444 = vmatpush1.msra.mxu1 %v433_v22  ;;  %v661_v33 = vld [vmem:[%s1875_s5 + $0x98] sm:$0xff]  ;;  %v644_v36 = vld [vmem:[%s1875_s5 + $0x10] sm:$0xff] }
   0xb   :  { %346 = vmatpush1.bf16.msra.mxu0 %v1384_v6  ;;  %1085 = vmatmul.mubr.msk.f32.vlgmr.msra.gmra.mrb[0].mxu1 %vm436_vm0, %v1583_v23  ;;  %v658_v27 = vld [vmem:[%s1875_s5 + $0x80] sm:$0xff]  ;;  %v659_v28 = vld [vmem:[%s1875_s5 + $0x88] sm:$0xff]  ;;  %v1273_v35 = vpack.c.bf16 %v661_v33, %v660_v32  ;;  %v645_v37 = vld [vmem:[%s1875_s5 + $0x18] sm:$0xff] }
   0xc   :  { %347 = vmatprep.subr.bf16.mxu0 %v1385_v7  ;;  %v642_v29 = vld [vmem:[%s1875_s5] sm:$0xff]  ;;  %513 = vmatprep.mubr.f32.mxu1 %v1460_v1  ;;  %v1269_v30 = vpack.c.bf16 %v659_v28, %v658_v27  ;;  %v643_v31 = vld [vmem:[%s1875_s5 + $0x8] sm:$0xff]  ;;  %v1409_v41 = vld [vmem:[%s1871_s2 + $0xb4] ss:$8 sps:$4 sm:$0xff]   ;;  %v1275_v42 = vpack.c.bf16 %v645_v37, %v644_v36 }
   0xd   :  { %v1271_v34 = vpack.c.bf16 %v643_v31, %v642_v29  ;;  %v662_v39 = vld [vmem:[%s1875_s5 + $0xa0] sm:$0xff]  ;;  %v663_v40 = vld [vmem:[%s1875_s5 + $0xa8] sm:$0xff]  ;;  %v1411_v46 = vld [vmem:[%s1871_s2 + $0xb0] ss:$8 sps:$4 sm:$0xff]  }
   0xe   :  { %1270 = vmatprep.subr.bf16.mxu1 %v1269_v30  ;;  %v1277_v43 = vpack.c.bf16 %v663_v40, %v662_v39  ;;  %v646_v44 = vld [vmem:[%s1875_s5 + $0x20] sm:$0xff]  ;;  %v647_v45 = vld [vmem:[%s1875_s5 + $0x28] sm:$0xff]  ;;  %v664_v47 = vld [vmem:[%s1875_s5 + $0xb0] sm:$0xff] }
   0xf   :  { %348 = vmatpush1.bf16.msra.mxu0 %v1387_v8  ;;  %1086 = vmatmul.mubr.msk.f32.gmra.mrb[2].mxu1 %vm436_vm0, %v1594_v26  ;;  %v665_v48 = vld [vmem:[%s1875_s5 + $0xb8] sm:$0xff]  ;;  %v1412_v49 = vld [vmem:[%s1871_s2 + $0xc4] ss:$8 sps:$4 sm:$0xff]   ;;  %v1279_v50 = vpack.c.bf16 %v647_v45, %v646_v44  ;;  %v648_v52 = vld [vmem:[%s1875_s5 + $0x30] sm:$0xff] }
  0x10   :  { %349 = vmatprep.subr.bf16.mxu0 %v1388_v9  ;;  %1272 = vmatpush3.bf16.msra.mxu1 %v1271_v34  ;;  %v1281_v51 = vpack.c.bf16 %v665_v48, %v664_v47  ;;  %v649_v53 = vld [vmem:[%s1875_s5 + $0x38] sm:$0xff]  ;;  %v1414_v54 = vld [vmem:[%s1871_s2 + $0xc0] ss:$8 sps:$4 sm:$0xff]   ;;  %v668_v63 = vld [vmem:[%s1875_s5 + $0xd0] sm:$0xff] }
  0x11   :  { %1274 = vmatprep.subr.bf16.mxu1 %v1273_v35  ;;  %v666_v55 = vld [vmem:[%s1875_s5 + $0xc0] sm:$0xff]  ;;  %v667_v56 = vld [vmem:[%s1875_s5 + $0xc8] sm:$0xff]  ;;  %v1415_v57 = vld [vmem:[%s1871_s2 + $0xd4] ss:$8 sps:$4 sm:$0xff]   ;;  %v1283_v58 = vpack.c.bf16 %v649_v53, %v648_v52 }
  0x12   :  { %v1285_v59 = vpack.c.bf16 %v667_v56, %v666_v55  ;;  %v650_v60 = vld [vmem:[%s1875_s5 + $0x40] sm:$0xff]  ;;  %v651_v61 = vld [vmem:[%s1875_s5 + $0x48] sm:$0xff]  ;;  %v1417_v62 = vld [vmem:[%s1871_s2 + $0xd0] ss:$8 sps:$4 sm:$0xff]  }
  0x13   :  { %350 = vmatpush1.bf16.msra.mxu0 %v1390_v10  ;;  %v669_v0 = vld [vmem:[%s1875_s5 + $0xd8] sm:$0xff]  ;;  %v1418_v2 = vld [vmem:[%s1871_s2 + $0xe4] ss:$8 sps:$4 sm:$0xff]   ;;  %v1287_v3 = vpack.c.bf16 %v651_v61, %v650_v60  ;;  %v652_v5 = vld [vmem:[%s1875_s5 + $0x50] sm:$0xff] }
  0x14   :  { %351 = vmatprep.subr.bf16.mxu0 %v1391_v11  ;;  %1276 = vmatpush3.bf16.msra.mxu1 %v1275_v42  ;;  %v1289_v4 = vpack.c.bf16 %v669_v0, %v668_v63  ;;  %v653_v6 = vld [vmem:[%s1875_s5 + $0x58] sm:$0xff]  ;;  %v1420_v7 = vld [vmem:[%s1871_s2 + $0xe0] ss:$8 sps:$4 sm:$0xff]   ;;  %v1429_v11 = vld [vmem:[%s1871_s2 + $0x104] ss:$8 sps:$4 sm:$0xff]  }
  0x15   :  { %1278 = vmatprep.subr.bf16.mxu1 %v1277_v43  ;;  %v1421_v8 = vld [vmem:[%s1871_s2 + $0xf4] ss:$8 sps:$4 sm:$0xff]   ;;  %v1291_v9 = vpack.c.bf16 %v653_v6, %v652_v5  ;;  %v1423_v10 = vld [vmem:[%s1871_s2 + $0xf0] ss:$8 sps:$4 sm:$0xff]   ;;  %v1441_v21 = vld [vmem:[%s1871_s2 + $0x144] ss:$8 sps:$4 sm:$0xff]  }
  0x16   :  { %v1432_v14 = vld [vmem:[%s1871_s2 + $0x114] ss:$8 sps:$4 sm:$0xff]   ;;  %v1439_v22 = vld [vmem:[%s1871_s2 + $0x140] ss:$8 sps:$4 sm:$0xff]   ;;  %v1447_v27 = vld [vmem:[%s1871_s2 + $0x164] ss:$8 sps:$4 sm:$0xff]  }
  0x17   :  { %352 = vmatpush1.bf16.msra.mxu0 %v1393_v12  ;;  %v1424_v12 = vld [vmem:[%s1872_s0] ss:$12 sps:$4 sm:$0xff]   ;;  %v1450_v29 = vld [vmem:[%s1871_s2 + $0x174] ss:$8 sps:$4 sm:$0xff]   ;;  %v1448_v30 = vld [vmem:[%s1871_s2 + $0x170] ss:$8 sps:$4 sm:$0xff]  }
  0x18   :  { %353 = vmatprep.subr.bf16.mxu0 %v1394_v13  ;;  %1280 = vmatpush3.bf16.msra.mxu1 %v1279_v50  ;;  %v1427_v13 = vld [vmem:[%s1871_s2 + $0x100] ss:$8 sps:$4 sm:$0xff]   ;;  %v435_v31 = vld [vmem:[%s1873_s3 + $0x10] sm:$0xff]  ;;  %v673_v39 = vld [vmem:[%s1875_s5 + $0xf8] sm:$0xff] }
  0x19   :  { %1282 = vmatprep.subr.bf16.mxu1 %v1281_v51  ;;  %v1445_v28 = vld [vmem:[%s1871_s2 + $0x160] ss:$8 sps:$4 sm:$0xff]   ;;  %v657_v42 = vld [vmem:[%s1875_s5 + $0x78] sm:$0xff] }
  0x1a   :  { %v1451_v32 = vld [vmem:[%s1872_s0 + $0x8] ss:$12 sps:$4 sm:$0xff]   ;;  %v670_v33 = vld [vmem:[%s1875_s5 + $0xe0] sm:$0xff] }
  0x1b   :  { %354 = vmatpush1.bf16.msra.mxu0 %v1396_v15  ;;  %v1430_v15 = vld [vmem:[%s1871_s2 + $0x110] ss:$8 sps:$4 sm:$0xff]   ;;  %v671_v34 = vld [vmem:[%s1875_s5 + $0xe8] sm:$0xff]  ;;  %v654_v36 = vld [vmem:[%s1875_s5 + $0x60] sm:$0xff] }
  0x1c   :  { %355 = vmatprep.subr.bf16.mxu0 %v1397_v16  ;;  %1284 = vmatpush3.bf16.msra.mxu1 %v1283_v58  ;;  %v1461_v16 = vmov 0   ;;  %v1293_v35 = vpack.c.bf16 %v671_v34, %v670_v33  ;;  %v674_v48 = vld [vmem:[%s1875_s5 + $0x100] sm:$0xff]  ;;  %v837_v6 = vld [vmem:[%s1877_s6 + $0x8] sm:$0xff]  ;;  %v842_v33 = vld [vmem:[%s1877_s6 + $0x30] sm:$0xff] }
  0x1d   :  { %1286 = vmatprep.subr.bf16.mxu1 %v1285_v59  ;;  %v836_v5 = vld [vmem:[%s1877_s6] sm:$0xff] }
  0x1f   :  { %356 = vmatpush1.bf16.msra.mxu0 %v1399_v17  ;;  %v1435_v17 = vld [vmem:[%s1871_s2 + $0x124] ss:$8 sps:$4 sm:$0xff]  }
  0x20   :  { %357 = vmatprep.subr.bf16.mxu0 %v1400_v18  ;;  %1288 = vmatpush3.bf16.msra.mxu1 %v1287_v3  ;;  %v1433_v18 = vld [vmem:[%s1871_s2 + $0x120] ss:$8 sps:$4 sm:$0xff]   ;;  %v1462_v3 = vmov 1.0  }
  0x21   :  { %1290 = vmatprep.subr.bf16.mxu1 %v1289_v4  ;;  %v676_v4 = vld [vmem:[%s1875_s5 + $0x110] sm:$0xff] }
  0x23   :  { %358 = vmatpush1.bf16.msra.mxu0 %v1402_v19  ;;  %v1438_v19 = vld [vmem:[%s1871_s2 + $0x134] ss:$8 sps:$4 sm:$0xff]  }
  0x24   :  { %359 = vmatprep.subr.bf16.mxu0 %v1403_v20  ;;  %1292 = vmatpush3.bf16.msra.mxu1 %v1291_v9  ;;  %v1436_v20 = vld [vmem:[%s1871_s2 + $0x130] ss:$8 sps:$4 sm:$0xff]  }
  0x25   :  { %1294 = vmatprep.subr.bf16.mxu1 %v1293_v35  ;;  %v844_v35 = vld [vmem:[%s1877_s6 + $0x40] sm:$0xff] }
  0x27   :  { %360 = vmatpush1.bf16.msra.mxu0 %v1405_v24  ;;  %v1444_v24 = vld [vmem:[%s1871_s2 + $0x154] ss:$8 sps:$4 sm:$0xff]  }
  0x28   :  { %361 = vmatprep.subr.bf16.mxu0 %v1406_v25  ;;  %v1442_v25 = vld [vmem:[%s1871_s2 + $0x150] ss:$8 sps:$4 sm:$0xff]  }
  0x2b   :  { %362 = vmatpush1.bf16.msra.mxu0 %v1408_v38  ;;  %v672_v38 = vld [vmem:[%s1875_s5 + $0xf0] sm:$0xff] }
  0x2c   :  { %363 = vmatprep.subr.bf16.mxu0 %v1409_v41  ;;  %v1297_v40 = vpack.c.bf16 %v673_v39, %v672_v38  ;;  %v656_v41 = vld [vmem:[%s1875_s5 + $0x70] sm:$0xff]  ;;  %v848_v38 = vld [vmem:[%s1877_s6 + $0x60] sm:$0xff] }
  0x2d   :  { %v1299_v43 = vpack.c.bf16 %v657_v42, %v656_v41  ;;  %v850_v42 = vld [vmem:[%s1877_s6 + $0x70] sm:$0xff] }
  0x2f   :  { %364 = vmatpush1.bf16.msra.mxu0 %v1411_v46  ;;  %v595_v46 = vld [vmem:[%s1876_s4] sm:$0x7] }
  0x30   :  { %365 = vmatprep.subr.bf16.mxu0 %v1412_v49  ;;  %v675_v49 = vld [vmem:[%s1875_s5 + $0x108] sm:$0xff] }
  0x31   :  { %v1301_v50 = vpack.c.bf16 %v675_v49, %v674_v48 }
  0x33   :  { %366 = vmatpush1.bf16.msra.mxu0 %v1414_v54 }
  0x34   :  { %367 = vmatprep.subr.bf16.mxu0 %v1415_v57 }
  0x37   :  { %368 = vmatpush1.bf16.msra.mxu0 %v1417_v62 }
  0x38   :  { %369 = vmatprep.subr.bf16.mxu0 %v1418_v2 }
  0x3b   :  { %370 = vmatpush1.bf16.msra.mxu0 %v1420_v7 }
  0x3c   :  { %371 = vmatprep.subr.bf16.mxu0 %v1421_v8  ;;  %v1809_v8 = vpack.c.bf16 %v837_v6, %v836_v5  ;;  %v1101_v5 = vld [vmem:[%s1878_s7] ss:$0 sm:$0xff] }
  0x3f   :  { %372 = vmatpush1.bf16.msra.mxu0 %v1423_v10 }
  0x40   :  { %384 = vmatprep.subr.bf16.mxu0 %v1429_v11 }
  0x42   :  { %374 = vmatmul.mubr.bf16.vlgmr.msra.gmra.mrb[0].mxu0 %v1424_v12 }
  0x43   :  { %385 = vmatpush1.bf16.msra.mxu0 %v1427_v13  ;;  %416 = vmatprep.mubr.bf16.mxu0 %v1461_v16 }
  0x44   :  { %386 = vmatprep.subr.bf16.mxu0 %v1432_v14 }
  0x47   :  { %387 = vmatpush1.bf16.msra.mxu0 %v1430_v15 }
  0x48   :  { %388 = vmatprep.subr.bf16.mxu0 %v1435_v17 }
  0x4b   :  { %389 = vmatpush1.bf16.msra.mxu0 %v1433_v18 }
  0x4c   :  { %390 = vmatprep.subr.bf16.mxu0 %v1438_v19 }
  0x4f   :  { %391 = vmatpush1.bf16.msra.mxu0 %v1436_v20  ;;  %v838_v20 = vld [vmem:[%s1877_s6 + $0x10] sm:$0xff] }
  0x50   :  { %392 = vmatprep.subr.bf16.mxu0 %v1441_v21  ;;  %v839_v21 = vld [vmem:[%s1877_s6 + $0x18] sm:$0xff] }
  0x53   :  { %393 = vmatpush1.bf16.msra.mxu0 %v1439_v22 }
  0x54   :  { %394 = vmatprep.subr.bf16.mxu0 %v1444_v24 }
  0x57   :  { %395 = vmatpush1.bf16.msra.mxu0 %v1442_v25 }
  0x58   :  { %396 = vmatprep.subr.bf16.mxu0 %v1447_v27  ;;  %v1309_v27 = vpack.c.bf16 %v839_v21, %v838_v20 }
  0x5b   :  { %397 = vmatpush1.bf16.msra.mxu0 %v1445_v28 }
  0x5c   :  { %398 = vmatprep.subr.bf16.mxu0 %v1450_v29 }
  0x5f   :  { %399 = vmatpush1.bf16.msra.mxu0 %v1448_v30  ;;  %v840_v30 = vld [vmem:[%s1877_s6 + $0x20] sm:$0xff] }
  0x60   :  { %1185 = vmatprep.subr.mxu0 %v435_v31 }
  0x62   :  { %417 = vmatmul.mubr.bf16.vlgmr.msra.gmra.mrb[0].mxu0 %v1451_v32 }
  0x63   :  { %1186 = vmatpush3.msra.mxu0 %v435_v31  ;;  %1187 = vmatprep.mubr.msk.f32.mxu0 %vm436_vm0, %v1583_v23  ;;  %v655_v23 = vld [vmem:[%s1875_s5 + $0x68] sm:$0xff] }
  0x64   :  { %v1295_v37 = vpack.c.bf16 %v655_v23, %v654_v36  ;;  %v841_v31 = vld [vmem:[%s1877_s6 + $0x28] sm:$0xff] }
  0x65   :  { %v1313_v32 = vpack.c.bf16 %v841_v31, %v840_v30  ;;  %v845_v36 = vld [vmem:[%s1877_s6 + $0x48] sm:$0xff] }
  0x66   :  { %1296 = vmatpush3.bf16.msra.mxu1 %v1295_v37  ;;  %v1321_v23 = vpack.c.bf16 %v845_v36, %v844_v35  ;;  %v846_v37 = vld [vmem:[%s1877_s6 + $0x50] sm:$0xff] }
  0x67   :  { %1298 = vmatprep.subr.bf16.mxu1 %v1297_v40  ;;  %v849_v40 = vld [vmem:[%s1877_s6 + $0x68] sm:$0xff] }
  0x68   :  { %v1329_v41 = vpack.c.bf16 %v849_v40, %v848_v38 }
  0x6a   :  { %1188 = vmatmul.mubr.msk.f32.vlgmr.msra.gmra.mrb[4].mxu0 %vm436_vm0, %v1594_v26  ;;  %v597_v26 = vlaneseq  ;;  %1300 = vmatpush3.bf16.msra.mxu1 %v1299_v43  ;;  %v851_v43 = vld [vmem:[%s1877_s6 + $0x78] sm:$0xff] }
  0x6b   :  { %1302 = vmatprep.subr.bf16.mxu1 %v1301_v50 }
  0x6c   :  { %v598_v44 = vshrl.u32 %v597_v26, 7  ;;  %v847_v26 = vld [vmem:[%s1877_s6 + $0x58] sm:$0xff] }
  0x6d   :  { %v1325_v39 = vpack.c.bf16 %v847_v26, %v846_v37 }
  0x6e   :  { %v607_v45 = vsub.s32 2, %v598_v44  ;;  %v599_v51 = vsub.s32 0, %v598_v44  ;;  %v603_v52 = vsub.s32 1, %v598_v44  ;;  %v1333_v44 = vpack.c.bf16 %v851_v43, %v850_v42 }
  0x70   :  { %v608_v47 = vrot.slane %v595_v46, %v607_v45  ;;  %v600_v53 = vrot.slane %v595_v46, %v599_v51  ;;  %v604_v54 = vrot.slane %v595_v46, %v603_v52 }
  0xde   :  { %v509_v55 = vpop.f32.mrb[0].mxu1 }
  0xdf   :  { %v612_v56 = vsub.f32 %v509_v55, %v600_v53  ;;  %v511_v57 = vpop.f32.mrb[1].mxu1 }
  0xe0   :  { %v613_v58 = vsub.f32 %v511_v57, %v604_v54 }
  0xe1   :  { %v618_v59 = vand.u32 2147483647, %v612_v56 }
  0xe2   :  { %v619_v60 = vand.u32 2147483647, %v613_v58  ;;  %v515_v61 = vpop.f32.mrb[2].mxu1 }
  0xe3   :  { %vm624_vm1 = vcmp.lt.f32.partialorder %v618_v59, 0.5  ;;  %v615_v62 = vsub.f32 %v515_v61, %v600_v53  ;;  %v517_v63 = vpop.f32.mrb[3].mxu1 }
  0xe4   :  { %vm625_vm2 = vcmp.lt.f32.partialorder %v619_v60, 0.5  ;;  %v616_v0 = vsub.f32 %v517_v63, %v604_v54 }
  0xe5   :  { %v621_v2 = vand.u32 2147483647, %v615_v62  ;;  %1095 = vmatprep.mubr.msk.f32.mxu1 %vm625_vm2, %v1462_v3 }
  0xe6   :  { %v622_v7 = vand.u32 2147483647, %v616_v0  ;;  %1096 = vmatmul.mubr.msk.f32.vlgmr.msra.gmra.mrb[4].mxu1 %vm624_vm1, %v1462_v3 }
  0xe7   :  { %vm627_vm3 = vcmp.lt.f32.partialorder %v621_v2, 0.5  ;;  %1304 = vmatpush3.bf16.msra.mxu1 %v1301_v50 }
  0xe8   :  { %vm628_vm4 = vcmp.lt.f32.partialorder %v622_v7, 0.5  ;;  %1194 = vmatprep.subr.mxu1 %v676_v4 }
  0xe9   :  { %1097 = vmatprep.mubr.msk.f32.mxu1 %vm628_vm4, %v1462_v3 }
  0xea   :  { %1098 = vmatmul.mubr.msk.f32.gmra.mrb[6].mxu1 %vm627_vm3, %v1462_v3 }
  0xeb   :  { %1195 = vmatpush3.msra.mxu1 %v676_v4 }
  0xec   :  { %1306 = vmatprep.subr.bf16.mxu1 %v1809_v8 }
 0x135   :  { %v418_v9 = vpop.f32.mrb[0].mxu0 }
 0x136   :  { %v420_v10 = vpop.f32.mrb[1].mxu0 }
 0x137   :  { %1452 = vtanh.f32 %v420_v10  ;;  %v422_v11 = vpop.f32.mrb[2].mxu0 }
 0x138   :  { %v424_v12 = vpop.f32.mrb[3].mxu0 }
 0x139   :  { %1454 = vtanh.f32 %v424_v12 }
 0x13d   :  { %v1189_v13 = vpop.f32.mrb[4].mxu0 }
 0x13e   :  { %v617_v14 = vsub.f32 %v1189_v13, %v608_v47  ;;  %v586_v15 = vpop.f32.mrb[5].mxu0 }
 0x13f   :  { %v614_v16 = vsub.f32 %v586_v15, %v608_v47 }
 0x140   :  { %v623_v17 = vand.u32 2147483647, %v617_v14 }
 0x141   :  { %v1453_v18 = vpop.eup %1452  ;;  %v620_v19 = vand.u32 2147483647, %v614_v16 }
 0x142   :  { %vm629_vm5 = vcmp.lt.f32.partialorder %v623_v17, 0.5  ;;  %v429_v22 = vadd.f32 %v1453_v18, %v418_v9 }
 0x143   :  { %v1455_v24 = vpop.eup %1454  ;;  %vm626_vm7 = vcmp.lt.f32.partialorder %v620_v19, 0.5  ;;  %v1094_v29 = vsel %vm629_vm5, 1.0, %v1460_v1 }
 0x144   :  { %v1091_v25 = vsel %vm626_vm7, 1.0, %v1460_v1  ;;  %v430_v28 = vadd.f32 %v1455_v24, %v422_v11  ;;  %v843_v1 = vld [vmem:[%s1877_s6 + $0x38] sm:$0xff] }
 0x145   :  { %1196 = vmatprep.mubr.msk.f32.mxu1 %vm677_vm6, %v1091_v25  ;;  %v1317_v34 = vpack.c.bf16 %v843_v1, %v842_v33 }
 0x146   :  { %1197 = vmatmul.mubr.msk.f32.vlgmr.msra.gmra.mrb[8].mxu1 %vm677_vm6, %v1094_v29 }
 0x147   :  { %1308 = vmatpush3.bf16.msra.mxu1 %v1809_v8 }
 0x148   :  { %1310 = vmatprep.subr.bf16.mxu1 %v1309_v27 }
 0x14b   :  { %1312 = vmatpush3.bf16.msra.mxu1 %v1309_v27 }
 0x14c   :  { %1314 = vmatprep.subr.bf16.mxu1 %v1313_v32 }
 0x14f   :  { %1316 = vmatpush3.bf16.msra.mxu1 %v1313_v32 }
 0x150   :  { %1318 = vmatprep.subr.bf16.mxu1 %v1317_v34 }
 0x153   :  { %1320 = vmatpush3.bf16.msra.mxu1 %v1317_v34 }
 0x154   :  { %1322 = vmatprep.subr.bf16.mxu1 %v1321_v23 }
 0x157   :  { %1324 = vmatpush3.bf16.msra.mxu1 %v1321_v23 }
 0x158   :  { %1326 = vmatprep.subr.bf16.mxu1 %v1325_v39 }
 0x15b   :  { %1328 = vmatpush3.bf16.msra.mxu1 %v1325_v39 }
 0x15c   :  { %1330 = vmatprep.subr.bf16.mxu1 %v1329_v41 }
 0x15f   :  { %1332 = vmatpush3.bf16.msra.mxu1 %v1329_v41 }
 0x160   :  { %1334 = vmatprep.subr.bf16.mxu1 %v1333_v44 }
 0x163   :  { %1336 = vmatpush3.bf16.msra.mxu1 %v1333_v44 }
 0x164   :  { %1338 = vmatprep.subr.bf16.mxu1 %v1809_v8 }
 0x1b9   :  { %v1138_v45 = vpop.f32.mrb[4].mxu1 }
 0x1ba   :  { %v1139_v46 = vpop.f32.mrb[5].mxu1 }
 0x1bb   :  { %v1140_v47 = vadd.f32 %v1139_v46, %v1138_v45 }
 0x1bd   :  { %v1141_v48 = vpop.f32.mrb[6].mxu1 }
 0x1be   :  { %v1142_v49 = vpop.f32.mrb[7].mxu1 }
 0x1bf   :  { %v1143_v50 = vadd.f32 %v1142_v49, %v1141_v48 }
 0x219   :  { %v1198_v51 = vpop.f32.mrb[8].mxu1 }
 0x21a   :  { %v831_v52 = vadd.f32 %v1198_v51, %v1143_v50  ;;  %v825_v53 = vpop.f32.mrb[9].mxu1 }
 0x21b   :  { %v826_v54 = vadd.f32 %v1140_v47, %v825_v53 }
 0x21c   :  { %v835_v55 = vadd.f32 %v831_v52, %v430_v28 }
 0x21d   :  { %v834_v56 = vadd.f32 %v826_v54, %v429_v22 }
 0x21f   :  { %1231 = vmatprep.mubr.f32.mxu1 %v834_v56 }
 0x220   :  { %1232 = vmatmul.mubr.f32.vlgmr.msra.gmra.mrb[10].mxu1 %v835_v55 }
 0x221   :  { %1340 = vmatpush3.bf16.msra.mxu1 %v1809_v8  ;;  %v1102_v8 = vld [vmem:[%s1879_s8] ss:$0 sm:$0xff] }
 0x222   :  { %1342 = vmatprep.subr.bf16.mxu1 %v1309_v27 }
 0x225   :  { %1344 = vmatpush3.bf16.msra.mxu1 %v1309_v27 }
 0x226   :  { %1346 = vmatprep.subr.bf16.mxu1 %v1313_v32 }
 0x229   :  { %1348 = vmatpush3.bf16.msra.mxu1 %v1313_v32 }
 0x22a   :  { %1350 = vmatprep.subr.bf16.mxu1 %v1317_v34 }
 0x22d   :  { %1352 = vmatpush3.bf16.msra.mxu1 %v1317_v34 }
 0x22e   :  { %1354 = vmatprep.subr.bf16.mxu1 %v1321_v23 }
 0x231   :  { %1356 = vmatpush3.bf16.msra.mxu1 %v1321_v23 }
 0x232   :  { %1358 = vmatprep.subr.bf16.mxu1 %v1325_v39 }
 0x235   :  { %1360 = vmatpush3.bf16.msra.mxu1 %v1325_v39 }
 0x236   :  { %1362 = vmatprep.subr.bf16.mxu1 %v1329_v41 }
 0x239   :  { %1364 = vmatpush3.bf16.msra.mxu1 %v1329_v41 }
 0x23a   :  { %1366 = vmatprep.subr.bf16.mxu1 %v1333_v44 }
 0x23d   :  { %1368 = vmatpush3.bf16.msra.mxu1 %v1333_v44 }
 0x2f3   :  { %v1233_v57 = vpop.f32.mrb[10].mxu1 }
 0x2f4   :  { %v928_v58 = vsub.f32 %v835_v55, %v1233_v57  ;;  %v918_v59 = vpop.f32.mrb[11].mxu1 }
 0x2f5   :  { %v927_v60 = vsub.f32 %v834_v56, %v918_v59 }
 0x2f6   :  { %v930_v62 = vmul.f32 %v928_v58, %v928_v58 }
 0x2f7   :  { %v929_v61 = vmul.f32 %v927_v60, %v927_v60 }
 0x2f9   :  { %1266 = vmatprep.mubr.f32.mxu1 %v929_v61 }
 0x2fa   :  { %1267 = vmatmul.mubr.f32.vlgmr.msra.gmra.mrb[12].mxu1 %v930_v62 }
 0x3cd   :  { %v1268_v63 = vpop.f32.mrb[12].mxu1 }
 0x3ce   :  { %v1003_v0 = vadd.f32 1e-05, %v1268_v63  ;;  %v997_v2 = vpop.f32.mrb[13].mxu1 }
 0x3cf   :  { %v998_v3 = vadd.f32 1e-05, %v997_v2 }
 0x3d0   :  { %1456 = vrsqrt.f32 %v1003_v0 }
 0x3d1   :  { %1458 = vrsqrt.f32 %v998_v3 }
 0x3da   :  { %v1457_v4 = vpop.eup %1456 }
 0x3db   :  { %v1459_v6 = vpop.eup %1458  ;;  %v1009_v7 = vmul.f32 %v1457_v4, %v928_v58 }
 0x3dc   :  { %v1008_v9 = vmul.f32 %v1459_v6, %v927_v60 }
 0x3dd   :  { %v1018_v10 = vmul.f32 %v1101_v5, %v1009_v7 }
 0x3de   :  { %v1017_v11 = vmul.f32 %v1101_v5, %v1008_v9 }
 0x3df   :  { %v1027_v12 = vadd.f32 %v1102_v8, %v1018_v10 }
 0x3e0   :  { %v1026_v13 = vadd.f32 %v1102_v8, %v1017_v11 }
 0x3e1   :  { %1029 = vst [vmem:[%s1880_s9 + $0x8] sm:$0xff] %v1027_v12 }
 0x3e2   :  { %1028 = vst [vmem:[%s1880_s9] sm:$0xff] %v1026_v13 }

</bundles_post_ra>
